<compile_context>
chip_gen: v6e
topology: v6e:2x2x1
jax: 0.10.0
libtpu: 0.0.40
codegen_flags: <defaults>
</compile_context>

<pallas_src>
import functools
import math

import jax
import jax.numpy as jnp
from jax.experimental import pallas as pl
from jax.experimental.pallas import tpu as pltpu


def _round_up(x, m):
    return ((x + m - 1) // m) * m


def _choose_q_tile(s, preferred):
    # Second-to-last block dim: multiple of 8, or the full sequence length.
    for t in (preferred, 512, 256, 128, 64, 32, 16, 8):
        if t <= s and s % t == 0:
            return t
    return s


def _choose_kv_tile(s, preferred):
    # TKV appears as a last (lane) dim of the bias block: multiple of 128 or full S.
    for t in (preferred, 512, 256, 128):
        if t <= s and s % t == 0:
            return t
    return s


def _sigmoid_attention_kernel(x_q_ref, x_kv_ref, wq_ref, bq_ref, wk_ref, bk_ref,
                              wv_ref, bv_ref, *rest, scale, has_bias):
    if has_bias:
        bias_ref, o_ref, q_scratch, acc_scratch = rest
    else:
        o_ref, q_scratch, acc_scratch = rest
        bias_ref = None

    ki = pl.program_id(2)
    n_kv = pl.num_programs(2)

    @pl.when(ki == 0)
    def _():
        # q projection for this (batch, q-tile): computed once, reused across kv tiles.
        xq = x_q_ref[0]                                              # (TQ, Dp) bf16
        q = jnp.dot(xq, wq_ref[...], preferred_element_type=jnp.float32)
        q = (q + bq_ref[...]) * scale                                # f32
        q_scratch[...] = q.astype(jnp.bfloat16)
        acc_scratch[...] = jnp.zeros_like(acc_scratch)

    # k / v projections for the current kv tile (recomputed per (q-tile, kv-tile);
    # see header note about megacore sharding).
    xkv = x_kv_ref[0]                                                # (TKV, Dp) bf16
    k = jnp.dot(xkv, wk_ref[...], preferred_element_type=jnp.float32) + bk_ref[...]
    v = jnp.dot(xkv, wv_ref[...], preferred_element_type=jnp.float32) + bv_ref[...]

    # scores = (q * scale) @ k^T — contract the feature axis of both operands
    # directly on the MXU (no explicit transpose).
    scores = jax.lax.dot_general(
        q_scratch[...], k.astype(jnp.bfloat16),
        dimension_numbers=(((1,), (1,)), ((), ())),
        preferred_element_type=jnp.float32)                          # (TQ, TKV) f32
    if has_bias:
        scores = scores + bias_ref[0]

    # sigmoid(x) = 1 / (1 + exp(-x)); exp and approx reciprocal both run on the EUP.
    weights = pl.reciprocal(1.0 + jnp.exp(-scores), approx=True)

    # Plain accumulate over kv tiles (no softmax rescaling needed).
    acc_scratch[...] += jnp.dot(weights.astype(jnp.bfloat16), v.astype(jnp.bfloat16),
                                preferred_element_type=jnp.float32)

    @pl.when(ki == n_kv - 1)
    def _():
        o_ref[0] = acc_scratch[...].astype(o_ref.dtype)


def sigmoid_attention(x, wq, bq, wk, bk, wv, bv, bias=None, *, tq=256, tkv=512):
    """x: (B, S, D); wq/wk/wv: (D, D) stored (in, out); bq/bk/bv: (D,) or (1, D);
    bias: (B, S, S) or None.  For v5e prefer tq=128 (128-wide MXU)."""
    B, S, D = x.shape
    out_dtype = x.dtype
    scale = 1.0 / math.sqrt(D)          # matches np.sqrt(feature_dim) in torch

    # --- lane-dense feature dim: zero-pad D to a multiple of 128 (exact) ---------
    D_pad = _round_up(D, 128)
    pad = D_pad - D
    if pad:
        x = jnp.pad(x, ((0, 0), (0, 0), (0, pad)))
        wq = jnp.pad(wq, ((0, pad), (0, pad)))
        wk = jnp.pad(wk, ((0, pad), (0, pad)))
        wv = jnp.pad(wv, ((0, pad), (0, pad)))
    bq = jnp.pad(jnp.reshape(bq, (1, -1)), ((0, 0), (0, pad))).astype(jnp.float32)
    bk = jnp.pad(jnp.reshape(bk, (1, -1)), ((0, 0), (0, pad))).astype(jnp.float32)
    bv = jnp.pad(jnp.reshape(bv, (1, -1)), ((0, 0), (0, pad))).astype(jnp.float32)

    # bf16 MXU operands (f32 accumulation happens inside the kernel).
    x_bf = x.astype(jnp.bfloat16)
    wq_bf = wq.astype(jnp.bfloat16)
    wk_bf = wk.astype(jnp.bfloat16)
    wv_bf = wv.astype(jnp.bfloat16)

    TQ = _choose_q_tile(S, tq)
    TKV = _choose_kv_tile(S, tkv)
    n_q, n_kv = S // TQ, S // TKV
    grid = (B, n_q, n_kv)

    has_bias = bias is not None
    kernel = functools.partial(_sigmoid_attention_kernel, scale=scale,
                               has_bias=has_bias)

    w_spec = pl.BlockSpec((D_pad, D_pad), lambda b, qi, ki: (0, 0))
    pbias_spec = pl.BlockSpec((1, D_pad), lambda b, qi, ki: (0, 0))

    in_specs = [
        pl.BlockSpec((1, TQ, D_pad), lambda b, qi, ki: (b, qi, 0)),    # x (q tile)
        pl.BlockSpec((1, TKV, D_pad), lambda b, qi, ki: (b, ki, 0)),   # x (kv tile)
        w_spec, pbias_spec,                                            # Wq, bq
        w_spec, pbias_spec,                                            # Wk, bk
        w_spec, pbias_spec,                                            # Wv, bv
    ]
    inputs = [x_bf, x_bf, wq_bf, bq, wk_bf, bk, wv_bf, bv]
    if has_bias:
        in_specs.append(pl.BlockSpec((1, TQ, TKV), lambda b, qi, ki: (b, qi, ki)))
        inputs.append(bias.astype(jnp.float32))

    # Advisory cost estimate for XLA's scheduler.
    proj_flops = 2 * B * S * D_pad * D_pad * (1 + 2 * n_q)   # q once; k/v per q-tile
    attn_flops = 2 * 2 * B * S * S * D_pad
    bytes_accessed = (2 * B * S * D_pad * 2            # x streamed for q- and kv-tiles
                      + 3 * D_pad * D_pad * 2          # weights (bf16)
                      + 3 * D_pad * 4                  # projection biases
                      + (B * S * S * 4 if has_bias else 0)
                      + B * S * D_pad * 4)             # output
    cost = pl.CostEstimate(flops=proj_flops + attn_flops,
                           transcendentals=B * S * S,  # exp per score element
                           bytes_accessed=bytes_accessed)

    out = pl.pallas_call(
        kernel,
        out_shape=jax.ShapeDtypeStruct((B, S, D_pad), out_dtype),
        grid_spec=pltpu.PrefetchScalarGridSpec(
            num_scalar_prefetch=0,
            grid=grid,
            in_specs=in_specs,
            out_specs=pl.BlockSpec((1, TQ, D_pad), lambda b, qi, ki: (b, qi, 0)),
            scratch_shapes=[
                pltpu.VMEM((TQ, D_pad), jnp.bfloat16),   # pre-scaled q tile
                pltpu.VMEM((TQ, D_pad), jnp.float32),    # output accumulator
            ],
        ),
        compiler_params=pltpu.CompilerParams(
            dimension_semantics=("parallel", "parallel", "arbitrary"),
            vmem_limit_bytes=48 * 1024 * 1024,
        ),
        cost_estimate=cost,
    )(*inputs)

    if pad:
        out = out[..., :D]
    return out


def _reference(x, wq, bq, wk, bk, wv, bv, bias, D):
    q = x @ wq + jnp.reshape(bq, (1, -1))
    k = x @ wk + jnp.reshape(bk, (1, -1))
    v = x @ wv + jnp.reshape(bv, (1, -1))
    s = jnp.einsum("bqd,bkd->bqk", q / math.sqrt(D), k)
    if bias is not None:
        s = s + bias
    return jax.nn.sigmoid(s) @ v


if __name__ == "__main__":
    B, S, D = 2, 8, 32
    num_heads = 4  # unused in the reference forward pass; kept for parity

    key = jax.random.PRNGKey(0)
    kx, kq, kk, kv, kbq, kbk, kbv, kbias = jax.random.split(key, 8)

    x = jax.random.normal(kx, (B, S, D), dtype=jnp.float32)

    # Deterministic nn.Linear-like init, stored pre-transposed as (D_in, D_out).
    lim = 1.0 / math.sqrt(D)
    wq = jax.random.uniform(kq, (D, D), jnp.float32, -lim, lim)
    wk = jax.random.uniform(kk, (D, D), jnp.float32, -lim, lim)
    wv = jax.random.uniform(kv, (D, D), jnp.float32, -lim, lim)
    bq = jax.random.uniform(kbq, (1, D), jnp.float32, -lim, lim)
    bk = jax.random.uniform(kbk, (1, D), jnp.float32, -lim, lim)
    bv = jax.random.uniform(kbv, (1, D), jnp.float32, -lim, lim)

    attn_bias = jax.random.normal(kbias, (B, S, S), dtype=jnp.float32) * 0.1

    # bf16 MXU operands + approx reciprocal -> compare at a bf16-level tolerance.
    tol = dict(atol=5e-2, rtol=5e-2)

    # With-bias path.
    out_b = jax.block_until_ready(
        sigmoid_attention(x, wq, bq, wk, bk, wv, bv, bias=attn_bias))
    ref_b = _reference(x, wq, bq, wk, bk, wv, bv, attn_bias, D)
    assert out_b.shape == (B, S, D)
    assert jnp.allclose(out_b, ref_b, **tol), "mismatch vs reference (bias)"

    # No-bias path (no dense zero bias is materialized).
    out_n = jax.block_until_ready(
        sigmoid_attention(x, wq, bq, wk, bk, wv, bv, bias=None))
    ref_n = _reference(x, wq, bq, wk, bk, wv, bv, None, D)
    assert out_n.shape == (B, S, D)
    assert jnp.allclose(out_n, ref_n, **tol), "mismatch vs reference (no bias)"

    print("KERNEL_OK")
</pallas_src>

<mosaic_0001>
module attributes {stable_mosaic.version = 11 : i64} {
  func.func @_sigmoid_attention_kernel(%arg0: i32, %arg1: i32, %arg2: i32, %arg3: memref<1x8x128xbf16, #tpu.memory_space<vmem>>, %arg4: memref<1x8x128xbf16, #tpu.memory_space<vmem>>, %arg5: memref<128x128xbf16, #tpu.memory_space<vmem>>, %arg6: memref<1x128xf32, #tpu.memory_space<vmem>>, %arg7: memref<128x128xbf16, #tpu.memory_space<vmem>>, %arg8: memref<1x128xf32, #tpu.memory_space<vmem>>, %arg9: memref<128x128xbf16, #tpu.memory_space<vmem>>, %arg10: memref<1x128xf32, #tpu.memory_space<vmem>>, %arg11: memref<1x8x8xf32, #tpu.memory_space<vmem>>, %arg12: memref<1x8x128xf32, #tpu.memory_space<vmem>>, %arg13: memref<8x128xbf16, #tpu.memory_space<vmem>>, %arg14: memref<8x128xf32, #tpu.memory_space<vmem>>) attributes {dimension_semantics = [#tpu.dimension_semantics<parallel>, #tpu.dimension_semantics<parallel>, #tpu.dimension_semantics<arbitrary>], iteration_bounds = array<i64: 2, 1, 1>, scalar_prefetch = 0 : i64, scratch_operands = 2 : i64, tpu.core_type = #tpu.core_type<tc>, window_params = [{transform_indices = @transform_0, window_bounds = array<i64: 1, 8, 128>}, {transform_indices = @transform_1, window_bounds = array<i64: 1, 8, 128>}, {pipeline_mode = #tpu.pipeline_mode<synchronous>, transform_indices = @transform_2, window_bounds = array<i64: 128, 128>}, {pipeline_mode = #tpu.pipeline_mode<synchronous>, transform_indices = @transform_3, window_bounds = array<i64: 1, 128>}, {pipeline_mode = #tpu.pipeline_mode<synchronous>, transform_indices = @transform_4, window_bounds = array<i64: 128, 128>}, {pipeline_mode = #tpu.pipeline_mode<synchronous>, transform_indices = @transform_5, window_bounds = array<i64: 1, 128>}, {pipeline_mode = #tpu.pipeline_mode<synchronous>, transform_indices = @transform_6, window_bounds = array<i64: 128, 128>}, {pipeline_mode = #tpu.pipeline_mode<synchronous>, transform_indices = @transform_7, window_bounds = array<i64: 1, 128>}, {transform_indices = @transform_8, window_bounds = array<i64: 1, 8, 8>}, {transform_indices = @transform_9, window_bounds = array<i64: 1, 8, 128>}]} {
    %c0_i32 = arith.constant 0 : i32
    %0 = arith.cmpi eq, %arg2, %c0_i32 : i32
    %1 = arith.extui %0 : i1 to i32
    %c0_i32_0 = arith.constant 0 : i32
    %2 = arith.cmpi ne, %1, %c0_i32_0 : i32
    scf.if %2 {
      %c0_27 = arith.constant 0 : index
      %c0_28 = arith.constant 0 : index
      %c0_29 = arith.constant 0 : index
      %36 = vector.load %arg3[%c0_27, %c0_28, %c0_29] : memref<1x8x128xbf16, #tpu.memory_space<vmem>>, vector<1x8x128xbf16>
      %37 = vector.shape_cast %36 : vector<1x8x128xbf16> to vector<8x128xbf16>
      %c0_30 = arith.constant 0 : index
      %c0_31 = arith.constant 0 : index
      %38 = vector.load %arg5[%c0_30, %c0_31] : memref<128x128xbf16, #tpu.memory_space<vmem>>, vector<128x128xbf16>
      %cst_32 = arith.constant dense<0.000000e+00> : vector<8x128xf32>
      %39 = tpu.matmul %37, %38, %cst_32 {dimension_numbers = #tpu.dot_dimension_numbers<[1], [0], [0], [1], [0, 0, 1, 1], [], []>} : vector<8x128xbf16>, vector<128x128xbf16>, vector<8x128xf32> -> vector<8x128xf32>
      %c0_33 = arith.constant 0 : index
      %c0_34 = arith.constant 0 : index
      %40 = vector.load %arg6[%c0_33, %c0_34] : memref<1x128xf32, #tpu.memory_space<vmem>>, vector<1x128xf32>
      %41 = vector.broadcast %40 : vector<1x128xf32> to vector<8x128xf32>
      %42 = arith.addf %39, %41 : vector<8x128xf32>
      %cst_35 = arith.constant 0.176776692 : f32
      %43 = vector.broadcast %cst_35 : f32 to vector<8x128xf32>
      %44 = arith.mulf %42, %43 : vector<8x128xf32>
      %45 = arith.truncf %44 : vector<8x128xf32> to vector<8x128xbf16>
      %c0_36 = arith.constant 0 : index
      %c0_37 = arith.constant 0 : index
      %46 = vector.load %arg13[%c0_36, %c0_37] : memref<8x128xbf16, #tpu.memory_space<vmem>>, vector<8x128xbf16>
      tpu.vector_store %arg13[%c0_36, %c0_37], %45 {strides = array<i32>} : memref<8x128xbf16, #tpu.memory_space<vmem>>, vector<8x128xbf16>,
      %cst_38 = arith.constant 0.000000e+00 : f32
      %47 = vector.broadcast %cst_38 : f32 to vector<8x128xf32>
      %c0_39 = arith.constant 0 : index
      %c0_40 = arith.constant 0 : index
      %48 = vector.load %arg14[%c0_39, %c0_40] : memref<8x128xf32, #tpu.memory_space<vmem>>, vector<8x128xf32>
      tpu.vector_store %arg14[%c0_39, %c0_40], %47 {strides = array<i32>} : memref<8x128xf32, #tpu.memory_space<vmem>>, vector<8x128xf32>,
    } else {
    }
    %c0 = arith.constant 0 : index
    %c0_1 = arith.constant 0 : index
    %c0_2 = arith.constant 0 : index
    %3 = vector.load %arg4[%c0, %c0_1, %c0_2] : memref<1x8x128xbf16, #tpu.memory_space<vmem>>, vector<1x8x128xbf16>
    %4 = vector.shape_cast %3 : vector<1x8x128xbf16> to vector<8x128xbf16>
    %c0_3 = arith.constant 0 : index
    %c0_4 = arith.constant 0 : index
    %5 = vector.load %arg7[%c0_3, %c0_4] : memref<128x128xbf16, #tpu.memory_space<vmem>>, vector<128x128xbf16>
    %cst = arith.constant dense<0.000000e+00> : vector<8x128xf32>
    %6 = tpu.matmul %4, %5, %cst {dimension_numbers = #tpu.dot_dimension_numbers<[1], [0], [0], [1], [0, 0, 1, 1], [], []>} : vector<8x128xbf16>, vector<128x128xbf16>, vector<8x128xf32> -> vector<8x128xf32>
    %c0_5 = arith.constant 0 : index
    %c0_6 = arith.constant 0 : index
    %7 = vector.load %arg8[%c0_5, %c0_6] : memref<1x128xf32, #tpu.memory_space<vmem>>, vector<1x128xf32>
    %8 = vector.broadcast %7 : vector<1x128xf32> to vector<8x128xf32>
    %9 = arith.addf %6, %8 : vector<8x128xf32>
    %c0_7 = arith.constant 0 : index
    %c0_8 = arith.constant 0 : index
    %10 = vector.load %arg9[%c0_7, %c0_8] : memref<128x128xbf16, #tpu.memory_space<vmem>>, vector<128x128xbf16>
    %cst_9 = arith.constant dense<0.000000e+00> : vector<8x128xf32>
    %11 = tpu.matmul %4, %10, %cst_9 {dimension_numbers = #tpu.dot_dimension_numbers<[1], [0], [0], [1], [0, 0, 1, 1], [], []>} : vector<8x128xbf16>, vector<128x128xbf16>, vector<8x128xf32> -> vector<8x128xf32>
    %c0_10 = arith.constant 0 : index
    %c0_11 = arith.constant 0 : index
    %12 = vector.load %arg10[%c0_10, %c0_11] : memref<1x128xf32, #tpu.memory_space<vmem>>, vector<1x128xf32>
    %13 = vector.broadcast %12 : vector<1x128xf32> to vector<8x128xf32>
    %14 = arith.addf %11, %13 : vector<8x128xf32>
    %c0_12 = arith.constant 0 : index
    %c0_13 = arith.constant 0 : index
    %15 = vector.load %arg13[%c0_12, %c0_13] : memref<8x128xbf16, #tpu.memory_space<vmem>>, vector<8x128xbf16>
    %16 = arith.truncf %9 : vector<8x128xf32> to vector<8x128xbf16>
    %cst_14 = arith.constant dense<0.000000e+00> : vector<8x8xf32>
    %17 = tpu.matmul %15, %16, %cst_14 {dimension_numbers = #tpu.dot_dimension_numbers<[1], [1], [0], [0], [0, 0, 1, 0], [], []>} : vector<8x128xbf16>, vector<8x128xbf16>, vector<8x8xf32> -> vector<8x8xf32>
    %c0_15 = arith.constant 0 : index
    %c0_16 = arith.constant 0 : index
    %c0_17 = arith.constant 0 : index
    %18 = vector.load %arg11[%c0_15, %c0_16, %c0_17] : memref<1x8x8xf32, #tpu.memory_space<vmem>>, vector<1x8x8xf32>
    %19 = vector.shape_cast %18 : vector<1x8x8xf32> to vector<8x8xf32>
    %20 = arith.addf %17, %19 : vector<8x8xf32>
    %cst_18 = arith.constant 0.000000e+00 : f32
    %21 = vector.broadcast %cst_18 : f32 to vector<8x8xf32>
    %22 = arith.subf %21, %20 : vector<8x8xf32>
    %23 = math.exp %22 : vector<8x8xf32>
    %cst_19 = arith.constant 1.000000e+00 : f32
    %24 = vector.broadcast %cst_19 : f32 to vector<8x8xf32>
    %25 = arith.addf %24, %23 : vector<8x8xf32>
    %26 = tpu.reciprocal %25 {approx = true} : vector<8x8xf32> -> vector<8x8xf32>
    %c0_20 = arith.constant 0 : index
    %c0_21 = arith.constant 0 : index
    %27 = vector.load %arg14[%c0_20, %c0_21] : memref<8x128xf32, #tpu.memory_space<vmem>>, vector<8x128xf32>
    %28 = arith.truncf %26 : vector<8x8xf32> to vector<8x8xbf16>
    %29 = arith.truncf %14 : vector<8x128xf32> to vector<8x128xbf16>
    %cst_22 = arith.constant dense<0.000000e+00> : vector<8x128xf32>
    %30 = tpu.matmul %28, %29, %cst_22 {dimension_numbers = #tpu.dot_dimension_numbers<[1], [0], [0], [1], [0, 0, 1, 1], [], []>} : vector<8x8xbf16>, vector<8x128xbf16>, vector<8x128xf32> -> vector<8x128xf32>
    %31 = arith.addf %27, %30 : vector<8x128xf32>
    %c0_23 = arith.constant 0 : index
    %c0_24 = arith.constant 0 : index
    %32 = vector.load %arg14[%c0_23, %c0_24] : memref<8x128xf32, #tpu.memory_space<vmem>>, vector<8x128xf32>
    tpu.vector_store %arg14[%c0_23, %c0_24], %31 {strides = array<i32>} : memref<8x128xf32, #tpu.memory_space<vmem>>, vector<8x128xf32>,
    %c0_i32_25 = arith.constant 0 : i32
    %33 = arith.cmpi eq, %arg2, %c0_i32_25 : i32
    %34 = arith.extui %33 : i1 to i32
    %c0_i32_26 = arith.constant 0 : i32
    %35 = arith.cmpi ne, %34, %c0_i32_26 : i32
    scf.if %35 {
      %c0_27 = arith.constant 0 : index
      %c0_28 = arith.constant 0 : index
      %36 = vector.load %arg14[%c0_27, %c0_28] : memref<8x128xf32, #tpu.memory_space<vmem>>, vector<8x128xf32>
      %c0_29 = arith.constant 0 : index
      %c0_30 = arith.constant 0 : index
      %c0_31 = arith.constant 0 : index
      %37 = vector.load %arg12[%c0_29, %c0_30, %c0_31] : memref<1x8x128xf32, #tpu.memory_space<vmem>>, vector<1x8x128xf32>
      %38 = vector.shape_cast %37 : vector<1x8x128xf32> to vector<8x128xf32>
      %39 = vector.shape_cast %36 : vector<8x128xf32> to vector<1x8x128xf32>
      tpu.vector_store %arg12[%c0_29, %c0_30, %c0_31], %39 {strides = array<i32>} : memref<1x8x128xf32, #tpu.memory_space<vmem>>, vector<1x8x128xf32>,
    } else {
    }
    return
  }
  func.func @transform_0(%arg0: i32, %arg1: i32, %arg2: i32) -> (i32, i32, i32) {
    %c0_i32 = arith.constant 0 : i32
    %c0_i32_0 = arith.constant 0 : i32
    return %arg0, %arg1, %c0_i32 : i32, i32, i32
  }
  func.func @transform_1(%arg0: i32, %arg1: i32, %arg2: i32) -> (i32, i32, i32) {
    %c0_i32 = arith.constant 0 : i32
    %c0_i32_0 = arith.constant 0 : i32
    return %arg0, %arg2, %c0_i32 : i32, i32, i32
  }
  func.func @transform_2(%arg0: i32, %arg1: i32, %arg2: i32) -> (i32, i32) {
    %c0_i32 = arith.constant 0 : i32
    %c0_i32_0 = arith.constant 0 : i32
    %c0_i32_1 = arith.constant 0 : i32
    return %c0_i32, %c0_i32_0 : i32, i32
  }
  func.func @transform_3(%arg0: i32, %arg1: i32, %arg2: i32) -> (i32, i32) {
    %c0_i32 = arith.constant 0 : i32
    %c0_i32_0 = arith.constant 0 : i32
    %c0_i32_1 = arith.constant 0 : i32
    return %c0_i32, %c0_i32_0 : i32, i32
  }
  func.func @transform_4(%arg0: i32, %arg1: i32, %arg2: i32) -> (i32, i32) {
    %c0_i32 = arith.constant 0 : i32
    %c0_i32_0 = arith.constant 0 : i32
    %c0_i32_1 = arith.constant 0 : i32
    return %c0_i32, %c0_i32_0 : i32, i32
  }
  func.func @transform_5(%arg0: i32, %arg1: i32, %arg2: i32) -> (i32, i32) {
    %c0_i32 = arith.constant 0 : i32
    %c0_i32_0 = arith.constant 0 : i32
    %c0_i32_1 = arith.constant 0 : i32
    return %c0_i32, %c0_i32_0 : i32, i32
  }
  func.func @transform_6(%arg0: i32, %arg1: i32, %arg2: i32) -> (i32, i32) {
    %c0_i32 = arith.constant 0 : i32
    %c0_i32_0 = arith.constant 0 : i32
    %c0_i32_1 = arith.constant 0 : i32
    return %c0_i32, %c0_i32_0 : i32, i32
  }
  func.func @transform_7(%arg0: i32, %arg1: i32, %arg2: i32) -> (i32, i32) {
    %c0_i32 = arith.constant 0 : i32
    %c0_i32_0 = arith.constant 0 : i32
    %c0_i32_1 = arith.constant 0 : i32
    return %c0_i32, %c0_i32_0 : i32, i32
  }
  func.func @transform_8(%arg0: i32, %arg1: i32, %arg2: i32) -> (i32, i32, i32) {
    %c0_i32 = arith.constant 0 : i32
    return %arg0, %arg1, %arg2 : i32, i32, i32
  }
  func.func @transform_9(%arg0: i32, %arg1: i32, %arg2: i32) -> (i32, i32, i32) {
    %c0_i32 = arith.constant 0 : i32
    %c0_i32_0 = arith.constant 0 : i32
    return %arg0, %arg1, %c0_i32 : i32, i32, i32
  }
}

</mosaic_0001>

<bundles_post_ra>
// kernel: tpu_custom_call.1
= control target key start
LH: loop header
LB: loop body
LE: loop exit
PB: predicated region body
PF: predicated region fallthrough
CT: control target
= control target key end

     0   :  { %s2028_s0 = inlined_call_operand.hbm [shape: bf16[2,8,128], index: 0, kind: input, shape index: {}]   ;;  %s2029_s1 = inlined_call_operand.hbm [shape: bf16[2,8,128], index: 1, kind: input, shape index: {}]   ;;  %s2030_s2 = inlined_call_operand.hbm [shape: bf16[128,128], index: 2, kind: input, shape index: {}]   ;;  %s2031_s3 = inlined_call_operand.vmem [shape: f32[1,128], index: 3, kind: input, shape index: {}]   ;;  %s2032_s4 = inlined_call_operand.hbm [shape: bf16[128,128], index: 4, kind: input, shape index: {}]   ;;  %s2033_s5 = inlined_call_operand.vmem [shape: f32[1,128], index: 5, kind: input, shape index: {}]   ;;  %s2034_s6 = inlined_call_operand.hbm [shape: bf16[128,128], index: 6, kind: input, shape index: {}]   ;;  %s2035_s7 = inlined_call_operand.vmem [shape: f32[1,128], index: 7, kind: input, shape index: {}]   ;;  %s2036_s8 = inlined_call_operand.hbm [shape: f32[2,8,8], index: 8, kind: input, shape index: {}]   ;;  %s2037_s9 = inlined_call_operand.hbm [shape: f32[2,8,128], index: 9, kind: output, shape index: {}]  }
   0x1   :  { %2043 = sst [smem:[#allocation25_spill]] %s2028_s0 }
   0x2   :  { %2044 = sst [smem:[#allocation26_spill]] %s2029_s1 }
   0x3   :  { %2045 = sst [smem:[#allocation27_spill]] %s2030_s2 }
   0x4   :  { %2046 = sst [smem:[#allocation28_spill]] %s2032_s4 }
   0x5   :  { %2047 = sst [smem:[#allocation29_spill]] %s2034_s6 }
   0x6   :  { %14 = vsyncpa [#allocation5], 0 }
   0x7   :  { %16 = vsyncpa [#allocation5 + $0x1], 0 }
   0x8   :  { %17 = vsyncpa [#allocation8], 0 }
   0x9   :  { %19 = vsyncpa [#allocation8 + $0x1], 0 }
   0xa   :  { %20 = vsyncpa [#allocation11], 0 }
   0xb   :  { %21 = vsyncpa [#allocation14], 0 }
   0xc   :  { %23 = vsyncpa [#allocation14 + $0x1], 0 }
   0xd   :  { %24 = vsyncpa [#allocation6], 0 }
   0xe   :  { %26 = vsyncpa [#allocation6 + $0x1], 0  ;;  %s1735_s30 = smov 0   ;;  %s1737_s10 = smov 0  }
   0xf   :  { %s1739_s11 = smov 0   ;;  %s1741_s12 = smov 0  }
  0x10   :  { %s1743_s13 = smov 0   ;;  %s1745_s14 = smov 0  }
  0x11 LB: > { %2048 = sst [smem:[#allocation22_spill]] %s1652_s30  ;;  %s1766_s15 = sadd.s32 4294967295, %s1672_s14   ;;  %s1672_s14 = sphi %s1745_s14, %s32_s14   ;;  %s1668_s13 = sphi %s1743_s13, %s2077_s13   ;;  %s1664_s12 = sphi %s1741_s12, %s2076_s12   ;;  %s1660_s11 = sphi %s1739_s11, %s2075_s11   ;;  %s1656_s10 = sphi %s1737_s10, %s2074_s10   ;;  %s1652_s30 = sphi %s1735_s30, %s2073_s30  }
  0x12   : > { %s1124_s16 = sadd.s32 4294967294, %s1672_s14   ;;  %p73_p0 = scmp.ne.s32.totalorder %s1656_s10, %s1652_s30 }
  0x13   : > { %p2038_p1 = scmp.eq.s32.totalorder %s1766_s15, 0  ;;  %p289_p3 = scmp.eq.s32.totalorder %s1124_s16, 1 }
  0x14   : > { %p1125_p5 = scmp.ge.s32.totalorder %s1672_s14, 1  ;;  %p296_p7 = scmp.lt.s32.totalorder %s1672_s14, 3 }
  0x15   : > { %p1775_p4 = por %p2038_p1, %p73_p0  ;;  %p1780_p6 = por %p289_p3, %p73_p0 }
  0x16   : > { %p1785_p8 = pnand %p1125_p5, %p296_p7  ;;  %s1674_s20 = smov [#allocation9]  }
  0x17   : > { %s2049_s17 = scalar_select %p1775_p4, 1, 0 }
  0x18   : > { %s2050_s18 = scalar_select %p1780_p6, 1, 0 }
  0x19   : > { %s308_s21 = sshll.u32 %s1674_s20, 4  ;;  %p1299_p9 = pneg %p1785_p8  ;;  %s309_s21 = int_to_ptr.vmem [resolvable:$true] %s308_s21 }
  0x1a   : > { %2051 = sst [smem:[#allocation23_spill]] %s2050_s18  ;;  %s1675_s23 = smov [#allocation10]  }
  0x1b   : > { %p1794_p11 = pnand %p1299_p9, %p2038_p1  ;;  %s324_s24 = sshll.u32 %s1675_s23, 4  ;;  %s325_s24 = int_to_ptr.vmem [resolvable:$true] %s324_s24 }
  0x1c   : > { %s1676_s25 = smov [#allocation12]   ;;  %s1425_s27 = scalar_lea.vmem %s309_s21, 1024 }
  0x1d   : > { %s340_s26 = sshll.u32 %s1676_s25, 4  ;;  %p1416_p12 = pneg %p1794_p11  ;;  %s341_s26 = int_to_ptr.vmem [resolvable:$true] %s340_s26 }
  0x1e   : > { %p1426_p13 = scmp.ne.s32.totalorder %s309_s21, %s1425_s27  ;;  %p1433_p5 = scmp.lt.s32.totalorder %s309_s21, %s309_s21 }
  0x1f   : > { %p1434_p7 = scmp.lt.s32.totalorder %s1425_s27, %s1425_s27 }
  0x20   : > { %p1428_p0 = pnand %p1426_p13, %p1416_p12 }
  0x21   : > { %p1435_p9 = por %p1434_p7, %p1433_p5 }
  0x22   : > { %p1429_p3 = pneg %p1428_p0 }
  0x24   : > { %p1436_p10 = pnand %p1435_p9, %p1429_p3 }
  0x26   : > { %1439 = shalt.err (!%p1436_p10)
}
  0x27   : > { %s1677_s28 = smov 64   ;;  %s1678_s29 = smov 4  }
  0x28   : > { %s2054_s2 = sld [smem:[#allocation27_spill]]  ;;  %s1451_s23 = scalar_lea.vmem %s325_s24, 1024 }
  0x29   : > { %p1452_p1 = scmp.ne.s32.totalorder %s325_s24, %s1451_s23  ;;  %p1459_p2 = scmp.lt.s32.totalorder %s325_s24, %s325_s24 }
  0x2a   : > { %p1460_p6 = scmp.lt.s32.totalorder %s1451_s23, %s1451_s23 }
  0x2b   : > { %p1454_p13 = pnand %p1452_p1, %p1416_p12 }
  0x2c   : > { %p1461_p5 = por %p1460_p6, %p1459_p2 }
  0x2d   : > { %p1455_p0 = pneg %p1454_p13 }
  0x2e   : > { %1302 = dma.hbm_to_vmem [thread:$0]  (!%p1794_p11), %s2054_s2, 1024, %s309_s21, [#allocation8], %s1677_s28, %s1677_s28, %s1678_s29  }
  0x2f   : > { %p1462_p3 = pnand %p1461_p5, %p1455_p0 }
  0x31   : > { %1465 = shalt.err (!%p1462_p3)
}
  0x32   : > { %s2055_s4 = sld [smem:[#allocation28_spill]]  ;;  %s1477_s21 = scalar_lea.vmem %s341_s26, 1024 }
  0x33   : > { %p1478_p10 = scmp.ne.s32.totalorder %s341_s26, %s1477_s21  ;;  %p1485_p9 = scmp.lt.s32.totalorder %s341_s26, %s341_s26 }
  0x34   : > { %p1486_p13 = scmp.lt.s32.totalorder %s1477_s21, %s1477_s21 }
  0x35   : > { %p1480_p7 = pnand %p1478_p10, %p1416_p12 }
  0x36   : > { %p1487_p4 = por %p1486_p13, %p1485_p9 }
  0x37   : > { %p1481_p1 = pneg %p1480_p7 }
  0x38   : > { %1305 = dma.hbm_to_vmem [thread:$0]  (!%p1794_p11), %s2055_s4, 1024, %s325_s24, [#allocation11], %s1677_s28, %s1677_s28, %s1678_s29  }
  0x39   : > { %p1488_p2 = pnand %p1487_p4, %p1481_p1 }
  0x3b   : > { %1491 = shalt.err (!%p1488_p2)
}
  0x3c   : > { %s2056_s6 = sld [smem:[#allocation29_spill]]  ;;  %s60_s24 = sadd.s32 1, %s1660_s11 }
  0x3d   : > { %s51_s23 = sadd.s32 1, %s1668_s13  ;;  %p67_p4 = scmp.ne.s32.totalorder %s1660_s11, %s1656_s10 }
  0x3e   : > { %p53_p6 = scmp.ge.s32.totalorder %s51_s23, 2  ;;  %p68_p12 = scmp.eq.s32.totalorder %s1672_s14, 0 }
  0x3f   : > { %p2057_p0 = scmp.eq.s32.totalorder %s1766_s15, 1  ;;  %p1326_p3 = scmp.lt.s32.totalorder %s1672_s14, 2 }
  0x40   : > { %s2079_s23 = smov (%p53_p6, %s51_s23), 0  ;;  %p69_p10 = por %p68_p12, %p67_p4 }
  0x41   : > { %p1831_p5 = por %p2057_p0, %p67_p4  ;;  %2059 = sst [smem:[#allocation24_spill]] %s2079_s23 }
  0x42   : > { %1308 = dma.hbm_to_vmem [thread:$0]  (!%p1794_p11), %s2056_s6, 1024, %s341_s26, [#allocation11], %s1677_s28, %s1677_s28, %s1678_s29  }
  0x43   : > { %s1839_s25 = sand.u32 1, %s1660_s11   ;;  %s55_s26 = ssub.s32 %s1668_s13, %s2079_s23 }
  0x44   : > { %p58_p11 = scmp.eq.s32.totalorder %s55_s26, 0  ;;  %s1130_s28 = sshll.u32 %s1839_s25, 2 }
  0x45   : > { %s1131_s29 = sshll.u32 %s1668_s13, 6  ;;  %s2060_s0 = sld [smem:[#allocation25_spill]] }
  0x46   : > { %s1846_s27 = scalar_select %p58_p11, %s1660_s11, %s60_s24  }
  0x47   : > { %s361_s2 = scalar_lea.vmem [#allocation4], %s1130_s28  ;;  %p1853_p7 = pnand %p1326_p3, %p69_p10 }
  0x48   : > { %s369_s4 = sshll.u32 %s361_s2, 4  ;;  %s2062_s1 = sld [smem:[#allocation26_spill]]  ;;  %s370_s4 = int_to_ptr.vmem [resolvable:$true] %s369_s4 }
  0x49   : > { %s376_s24 = sand.u32 1, %s1672_s14   ;;  %s358_s23 = scalar_lea.sflag [#allocation5], %s1839_s25 }
  0x4a   : > { %p1494_p1 = pneg %p1853_p7  ;;  %s1505_s21 = scalar_lea.vmem %s370_s4, 64 }
  0x4b   : > { %s367_s20 = scalar_lea.hbm %s2060_s0, %s1131_s29  ;;  %p1506_p9 = scmp.ne.s32.totalorder %s370_s4, %s1505_s21 }
  0x4c   : > { %s1679_s2 = smov [#allocation4]  }
  0x4d   : > { %p1508_p13 = pnand %p1506_p9, %p1494_p1  ;;  %s1510_s16 = sshll.u32 %s1679_s2, 4  ;;  %s1511_s16 = int_to_ptr.vmem [resolvable:$false] %s1510_s16 }
  0x4e   : > { %s1860_s26 = scalar_lea.hbm %s2062_s1, %s1131_s29  ;;  %s1512_s0 = scalar_lea.vmem %s1511_s16, 128 }
  0x4f   : > { %p1509_p2 = pneg %p1508_p13  ;;  %p1513_p4 = scmp.lt.s32.totalorder %s370_s4, %s1511_s16 }
  0x50   : > { %p1514_p6 = scmp.lt.s32.totalorder %s1512_s0, %s1505_s21 }
  0x52   : > { %p1515_p12 = por %p1514_p6, %p1513_p4 }
  0x54   : > { %p1516_p0 = pnand %p1515_p12, %p1509_p2 }
  0x56   : > { %1519 = shalt.err (!%p1516_p0)
}
  0x57   : > { %1312 = dma.hbm_to_vmem [thread:$0]  (!%p1853_p7), %s367_s20, 64, %s370_s4, %s358_s23  }
  0x58   : > { %s380_s30 = scalar_lea.vmem [#allocation7], %s1130_s28  ;;  %s377_s29 = scalar_lea.sflag [#allocation8], %s376_s24 }
  0x59   : > { %s388_s18 = sshll.u32 %s380_s30, 4  ;;  %s1680_s2 = smov [#allocation7]   ;;  %s389_s18 = int_to_ptr.vmem [resolvable:$true] %s388_s18 }
  0x5a   : > { %s1533_s1 = scalar_lea.vmem %s389_s18, 64  ;;  %s1538_s16 = sshll.u32 %s1680_s2, 4  ;;  %s1539_s16 = int_to_ptr.vmem [resolvable:$false] %s1538_s16 }
  0x5b   : > { %p1534_p3 = scmp.ne.s32.totalorder %s389_s18, %s1533_s1  ;;  %s1540_s0 = scalar_lea.vmem %s1539_s16, 128 }
  0x5c   : > { %p1541_p9 = scmp.lt.s32.totalorder %s389_s18, %s1539_s16  ;;  %p1542_p13 = scmp.lt.s32.totalorder %s1540_s0, %s1533_s1 }
  0x5d   : > { %p1536_p10 = pnand %p1534_p3, %p1494_p1 }
  0x5e   : > { %p1543_p2 = por %p1542_p13, %p1541_p9 }
  0x5f   : > { %p1537_p11 = pneg %p1536_p10 }
  0x61   : > { %p1544_p4 = pnand %p1543_p2, %p1537_p11 }
  0x63   : > { %1547 = shalt.err (!%p1544_p4)
}
  0x64   : > { %1315 = dma.hbm_to_vmem [thread:$0]  (!%p1853_p7), %s1860_s26, 64, %s389_s18, %s377_s29  }
  0x65   : > { %s1134_s4 = sshll.u32 %s1839_s25, 3  ;;  %s1135_s23 = sshll.u32 %s1668_s13, 7 }
  0x66   : > { %s406_s24 = scalar_lea.hbm %s2036_s8, %s1135_s23  ;;  %s399_s21 = scalar_lea.vmem [#allocation13], %s1134_s4 }
  0x67   : > { %s408_s30 = sshll.u32 %s399_s21, 4  ;;  %s396_s1 = scalar_lea.sflag [#allocation14], %s1839_s25  ;;  %s409_s30 = int_to_ptr.vmem [resolvable:$true] %s408_s30 }
  0x68   : > { %s1561_s2 = scalar_lea.vmem %s409_s30, 128  ;;  %s1681_s16 = smov [#allocation13]  }
  0x69   : > { %p1562_p6 = scmp.ne.s32.totalorder %s409_s30, %s1561_s2  ;;  %s1566_s0 = sshll.u32 %s1681_s16, 4  ;;  %s1567_s0 = int_to_ptr.vmem [resolvable:$false] %s1566_s0 }
  0x6a   : > { %s1568_s26 = scalar_lea.vmem %s1567_s0, 256  ;;  %p1569_p3 = scmp.lt.s32.totalorder %s409_s30, %s1567_s0 }
  0x6b   : > { %p1564_p12 = pnand %p1562_p6, %p1494_p1  ;;  %p1570_p10 = scmp.lt.s32.totalorder %s1568_s26, %s1561_s2 }
  0x6d   : > { %p1565_p0 = pneg %p1564_p12  ;;  %p1571_p11 = por %p1570_p10, %p1569_p3 }
  0x6f   : > { %p1572_p9 = pnand %p1571_p11, %p1565_p0 }
  0x71   : > { %1575 = shalt.err (!%p1572_p9)
}
  0x72   : > { %1318 = dma.hbm_to_vmem [thread:$0]  (!%p1853_p7), %s406_s24, 128, %s409_s30, %s396_s1  }
  0x73   : > { %417 = sbr.rel (%p1785_p8) target bundleno = 815 (0x32f), region = 56  ;;  %s1891_s25 = sand.u32 (!%p1785_p8), 1, %s1656_s10  }
  0x74   : > { %s1137_s18 = sshll.u32 (!%p1785_p8), %s1891_s25, 2  ;;  %s420_s29 = scalar_lea.sflag (!%p1785_p8), [#allocation5], %s1891_s25 }
  0x75   : > { %s1895_s4 = scalar_lea.vmem (!%p1785_p8), [#allocation4], %s1137_s18  ;;  %p2063_p1 = scmp.ne.s32.totalorder (!%p1785_p8), %s2049_s17, 0 }
  0x78   : > { %1627 = dma.done.wait (%p2063_p1), %s420_s29, 64  }
  0x79   : > { %1629 = vsyncadd (%p2063_p1), %s420_s29, 4294967232  ;;  %s428_s6 = sand.u32 1, %s1766_s15   ;;  %s1902_s23 = scalar_lea.vmem [#allocation7], %s1137_s18 }
  0x7a   : > { %s429_s19 = scalar_lea.sflag [#allocation8], %s428_s6 }
  0x7b   : > { %1631 = dma.done.wait (%p2063_p1), %s429_s19, 64  }
  0x7c   : > { %1633 = vsyncadd (%p2063_p1), %s429_s19, 4294967232  ;;  %p2064_p8 = scmp.eq.s32.totalorder %s1766_s15, 0 }
  0x7e   : > { %1635 = dma.done.wait (%p2064_p8), [#allocation8], 1024   ;;  %p2065_p7 = pmov %p2064_p8 }
  0x80   : > { %1637 = vsyncadd (%p2065_p7), [#allocation8], 4294966272  ;;  %p2066_p13 = pmov %p2065_p7 }
  0x81   : > { %p2067_p2 = pmov %p2065_p7 }
  0x82   : > { %1639 = dma.done.wait (%p2066_p13), [#allocation11], 2048  }
  0x83   : > { %1641 = vsyncadd (%p2067_p2), [#allocation11], 4294965248  ;;  %s1142_s28 = sshll.u32 %s1891_s25, 3  ;;  %s450_s20 = scalar_lea.sflag [#allocation14], %s1891_s25 }
  0x84   : > { %s1920_s24 = scalar_lea.vmem [#allocation13], %s1142_s28 }
  0x85   : > { %1643 = dma.done.wait (%p2063_p1), %s450_s20, 128  }
  0x86   : > { %1645 = vsyncadd (%p2063_p1), %s450_s20, 4294967168  ;;  %v1682_v0 = vmov 0.0   ;;  %vm1683_vm0 = vmmov 0   ;;  %v1386_v1 = vld [vmem:[#allocation9 + $0x38] sm:$0xff]   ;;  %v1388_v3 = vld [vmem:[#allocation9 + $0x30] sm:$0xff]   ;;  %vm897_vm1 = vcmask 1043456  }
  0x87   : > { %1207 = vmatprep.subr.bf16.mxu0 %v1682_v0  ;;  %1227 = vmatprep.subr.bf16.mxu1 %v1682_v0  ;;  %v1387_v2 = vld [vmem:[#allocation10 + $0x38] sm:$0xff]   ;;  %v1389_v4 = vld [vmem:[#allocation10 + $0x30] sm:$0xff]   ;;  %v1390_v5 = vld [vmem:[#allocation9 + $0x28] sm:$0xff]   ;;  %vm893_vm2 = vcmask 64512   ;;  %s497_s16 = scalar_lea.vmem [#allocation15], %s1142_s28  ;;  %s1173_s26 = sshll.u32 %s1664_s12, 7 }
  0x88   : > { %1223 = vmatprep.mubr.msk.bf16.mxu0 %vm1683_vm0, %v1682_v0  ;;  %1243 = vmatprep.mubr.msk.bf16.mxu1 %vm1683_vm0, %v1682_v0  ;;  %v1391_v6 = vld [vmem:[#allocation10 + $0x28] sm:$0xff]   ;;  %v1392_v7 = vld [vmem:[#allocation9 + $0x20] sm:$0xff]   ;;  %v1394_v9 = vld [vmem:[#allocation9 + $0x18] sm:$0xff]   ;;  %s963_s0 = sshll.u32 %s497_s16, 4  ;;  %s949_s6 = scalar_lea.sflag [#allocation6], %s1891_s25  ;;  %s1977_s0 = int_to_ptr.vmem [resolvable:$true] %s963_s0 }
  0x89   : > { %1208 = vmatpush3.bf16.msra.mxu0 %v1386_v1  ;;  %1228 = vmatpush3.bf16.msra.mxu1 %v1387_v2  ;;  %v1393_v8 = vld [vmem:[#allocation10 + $0x20] sm:$0xff]   ;;  %v1395_v10 = vld [vmem:[#allocation10 + $0x18] sm:$0xff]   ;;  %v1396_v11 = vld [vmem:[#allocation9 + $0x10] sm:$0xff]   ;;  %s1576_s19 = scalar_lea.vmem %s1977_s0, 128  ;;  %s1684_s12 = smov [#allocation15]  }
  0x8a   : > { %1209 = vmatprep.subr.bf16.mxu0 %v1682_v0  ;;  %1229 = vmatprep.subr.bf16.mxu1 %v1682_v0  ;;  %v1397_v12 = vld [vmem:[#allocation10 + $0x10] sm:$0xff]   ;;  %v1398_v13 = vld [vmem:[#allocation9 + $0x8] sm:$0xff]   ;;  %v1400_v15 = vld [vmem:[#allocation9] sm:$0xff]   ;;  %p1577_p4 = scmp.ne.s32.totalorder %s1977_s0, %s1576_s19 }
  0x8b   : > { %v1399_v14 = vld [vmem:[#allocation10 + $0x8] sm:$0xff]   ;;  %v1401_v16 = vld [vmem:[#allocation10] sm:$0xff]   ;;  %v503_v17 = vld [vmem:[%s1895_s4] sm:$0xf]  ;;  %s1982_s4 = scalar_lea.hbm %s2037_s9, %s1173_s26 }
  0x8c   : > { %v619_v18 = vld [vmem:[%s1902_s23] sm:$0xf]  ;;  %v1403_v20 = vld [vmem:[#allocation12 + $0x30] sm:$0xff]   ;;  %v1404_v21 = vld [vmem:[#allocation12 + $0x28] sm:$0xff]   ;;  %p1578_p6 = pnand %p1577_p4, %p1831_p5  ;;  %s1580_s23 = sshll.u32 %s1684_s12, 4  ;;  %s1581_s23 = int_to_ptr.vmem [resolvable:$false] %s1580_s23 }
  0x8d   : > { %1210 = vmatpush3.bf16.msra.mxu0 %v1388_v3  ;;  %1230 = vmatpush3.bf16.msra.mxu1 %v1389_v4  ;;  %v1402_v19 = vld [vmem:[#allocation12 + $0x38] sm:$0xff]   ;;  %v1405_v22 = vld [vmem:[#allocation12 + $0x20] sm:$0xff]   ;;  %v1407_v24 = vld [vmem:[#allocation12 + $0x10] sm:$0xff]   ;;  %s1582_s28 = scalar_lea.vmem %s1581_s23, 256  ;;  %p1583_p0 = scmp.lt.s32.totalorder %s1977_s0, %s1581_s23 }
  0x8e   : > { %1211 = vmatprep.subr.bf16.mxu0 %v1682_v0  ;;  %1231 = vmatprep.subr.bf16.mxu1 %v1682_v0  ;;  %v1406_v23 = vld [vmem:[#allocation12 + $0x18] sm:$0xff]   ;;  %v1408_v25 = vld [vmem:[#allocation12 + $0x8] sm:$0xff]   ;;  %v1409_v26 = vld [vmem:[#allocation12] sm:$0xff]   ;;  %p1579_p12 = pneg %p1578_p6  ;;  %p1584_p3 = scmp.lt.s32.totalorder %s1582_s28, %s1576_s19 }
  0x8f   : > { %v1144_v27 = vld [vmem:[%s2031_s3] ss:$0 sm:$0xff] }
  0x90   : > { %v1153_v28 = vld [vmem:[%s2033_s5] ss:$0 sm:$0xff]  ;;  %p1585_p10 = por %p1584_p3, %p1583_p0 }
  0x91   : > { %1212 = vmatpush3.bf16.msra.mxu0 %v1390_v5  ;;  %1232 = vmatpush3.bf16.msra.mxu1 %v1391_v6  ;;  %v1162_v46 = vld [vmem:[%s2035_s7] ss:$0 sm:$0xff] }
  0x92   : > { %1213 = vmatprep.subr.bf16.mxu0 %v1682_v0  ;;  %1233 = vmatprep.subr.bf16.mxu1 %v1682_v0  ;;  %v844_v51 = vld [vmem:[%s1920_s24] sm:$0xff]  ;;  %p1586_p11 = pnand %p1585_p10, %p1579_p12 }
  0x95   : > { %1214 = vmatpush3.bf16.msra.mxu0 %v1392_v7  ;;  %1234 = vmatpush3.bf16.msra.mxu1 %v1393_v8 }
  0x96   : > { %1215 = vmatprep.subr.bf16.mxu0 %v1682_v0  ;;  %1235 = vmatprep.subr.bf16.mxu1 %v1682_v0 }
  0x99   : > { %1216 = vmatpush3.bf16.msra.mxu0 %v1394_v9  ;;  %1236 = vmatpush3.bf16.msra.mxu1 %v1395_v10 }
  0x9a   : > { %1217 = vmatprep.subr.bf16.mxu0 %v1682_v0  ;;  %1237 = vmatprep.subr.bf16.mxu1 %v1682_v0 }
  0x9d   : > { %1218 = vmatpush3.bf16.msra.mxu0 %v1396_v11  ;;  %1238 = vmatpush3.bf16.msra.mxu1 %v1397_v12 }
  0x9e   : > { %1219 = vmatprep.subr.bf16.mxu0 %v1682_v0  ;;  %1239 = vmatprep.subr.bf16.mxu1 %v1682_v0 }
  0xa1   : > { %1220 = vmatpush3.bf16.msra.mxu0 %v1398_v13  ;;  %1240 = vmatpush3.bf16.msra.mxu1 %v1399_v14 }
  0xa2   : > { %1221 = vmatprep.subr.bf16.mxu0 %v1682_v0  ;;  %1241 = vmatprep.subr.bf16.mxu1 %v1682_v0 }
  0xa5   : > { %1222 = vmatpush3.bf16.msra.mxu0 %v1400_v15  ;;  %1242 = vmatpush3.bf16.msra.mxu1 %v1401_v16 }
  0xa6   : > { %1247 = vmatprep.subr.bf16.mxu0 %v1682_v0  ;;  %1267 = vmatprep.subr.bf16.mxu1 %v1682_v0 }
  0xa8   : > { %1224 = vmatmul.mubr.bf16.vlgmr.msra.gmra.mxu0 %v503_v17  ;;  %1244 = vmatmul.mubr.bf16.vlgmr.msra.gmra.mxu1 %v619_v18 }
  0xa9   : > { %1263 = vmatprep.mubr.msk.bf16.mxu0 %vm1683_vm0, %v1682_v0  ;;  %1269 = vmatprep.mubr.msk.bf16.mxu1 %vm1683_vm0, %v1682_v0 }
  0xaa   : > { %1248 = vmatpush3.bf16.msra.mxu0 %v1402_v19 }
  0xab   : > { %1249 = vmatprep.subr.bf16.mxu0 %v1682_v0 }
  0xae   : > { %1250 = vmatpush3.bf16.msra.mxu0 %v1403_v20 }
  0xaf   : > { %1251 = vmatprep.subr.bf16.mxu0 %v1682_v0 }
  0xb2   : > { %1252 = vmatpush3.bf16.msra.mxu0 %v1404_v21 }
  0xb3   : > { %1253 = vmatprep.subr.bf16.mxu0 %v1682_v0 }
  0xb6   : > { %1254 = vmatpush3.bf16.msra.mxu0 %v1405_v22 }
  0xb7   : > { %1255 = vmatprep.subr.bf16.mxu0 %v1682_v0 }
  0xba   : > { %1256 = vmatpush3.bf16.msra.mxu0 %v1406_v23 }
  0xbb   : > { %1257 = vmatprep.subr.bf16.mxu0 %v1682_v0 }
  0xbe   : > { %1258 = vmatpush3.bf16.msra.mxu0 %v1407_v24 }
  0xbf   : > { %1259 = vmatprep.subr.bf16.mxu0 %v1682_v0 }
  0xc2   : > { %1260 = vmatpush3.bf16.msra.mxu0 %v1408_v25 }
  0xc3   : > { %1261 = vmatprep.subr.bf16.mxu0 %v1682_v0 }
  0xc6   : > { %1262 = vmatpush3.bf16.msra.mxu0 %v1409_v26 }
  0xc9   : > { %1264 = vmatmul.mubr.bf16.vlgmr.msra.gmra.mxu0 %v619_v18 }
 0x168   : > { %v609_v29 = vpop.f32.mrf.mxu0  ;;  %v725_v31 = vpop.f32.mrf.mxu1 }
 0x169   : > { %v610_v30 = vadd.f32 %v1144_v27, %v609_v29  ;;  %v726_v32 = vadd.f32 %v1153_v28, %v725_v31 }
 0x16a   : > { %v1225_v33 = vpop.f32.mrf.mxu0  ;;  %v1245_v35 = vpop.f32.mrf.mxu1 }
 0x16b   : > { %v615_v34 = vmul.f32 0.17677669, %v610_v30  ;;  %v843_v36 = vpack.c.bf16 %v726_v32, %v726_v32 }
 0x16c   : > { %v612_v37 = vpop.f32.mrf.mxu0  ;;  %v728_v39 = vpop.f32.mrf.mxu1 }
 0x16d   : > { %v616_v38 = vpack.c.bf16 %v615_v34, %v615_v34  ;;  %1268 = vmatpush3.bf16.xpose.msra.mxu1 %v843_v36 }
 0x16e   : > { %v1226_v40 = vpop.f32.mrf.mxu0  ;;  %v1246_v41 = vpop.f32.mrf.mxu1  ;;  %1273 = vmatprep.subr.bf16.mxu1 %v1682_v0 }
 0x16f   : > { %617 = vst [vmem:[#allocation2] sm:$0xf] %v616_v38 }
 0x176   : > { %v842_v42 = vld [vmem:[#allocation2] sm:$0xf] }
 0x177   : > { %1270 = vmatmul.mubr.bf16.vlgmr.msra.gmra.mxu1 %v842_v42 }
 0x178   : > { %1275 = vmatprep.mubr.msk.bf16.mxu1 %vm1683_vm0, %v1682_v0 }
 0x189   : > { %v836_v43 = vpop.f32.mrf.mxu0 }
 0x18a   : > { %v837_v48 = vadd.f32 %v1162_v46, %v836_v43 }
 0x18b   : > { %v1265_v44 = vpop.f32.mrf.mxu0 }
 0x18c   : > { %v892_v49 = vpack.c.bf16 %v837_v48, %v837_v48 }
 0x18d   : > { %v839_v45 = vpop.f32.mrf.mxu0 }
 0x18e   : > { %v899_v50 = vsel %vm897_vm1, %v892_v49, 0 }
 0x18f   : > { %v1266_v47 = vpop.f32.mrf.mxu0  ;;  %1274 = vmatpush3.bf16.msra.mxu1 %v899_v50 }
 0x237   : > { %v879_v52 = vpop.f32.mrf.mxu1 }
 0x238   : > { %v880_v53 = vadd.f32 %v879_v52, %v844_v51 }
 0x239   : > { %v1271_v54 = vpop.f32.mrf.mxu1 }
 0x23a   : > { %v885_v55 = vsub.f32 0.0, %v880_v53 }
 0x23b   : > { %v882_v56 = vpop.f32.mrf.mxu1 }
 0x23c   : > { %v886_v57 = vmul.f32 1.442695, %v885_v55 }
 0x23d   : > { %v1272_v58 = vpop.f32.mrf.mxu1 }
 0x23e   : > { %1410 = vpow2.f32 %v886_v57 }
 0x24b   : > { %v1411_v59 = vpop.eup %1410 }
 0x24c   : > { %v888_v60 = vadd.f32 1.0, %v1411_v59 }
 0x24e   : > { %1412 = vrcp.f32 %v888_v60 }
 0x25b   : > { %v1413_v61 = vpop.eup %1412 }
 0x25c   : > { %v891_v62 = vpack.c.bf16 %v1413_v61, %v1413_v61 }
 0x25e   : > { %1276 = vmatmul.mubr.msk.bf16.vlgmr.msra.gmra.mxu1 %vm893_vm2, %v891_v62 }
 0x31e   : > { %v935_v63 = vpop.f32.mrf.mxu1 }
 0x31f   : > { %947 = vst [vmem:[%s497_s16] sm:$0xff] %v935_v63 }
 0x320   : > { %v1277_v0 = vpop.f32.mrf.mxu1 }
 0x321   : > { %1589 = shalt.err (!%p1586_p11)
}
 0x322   : > { %s1590_s20 = scalar_lea.hbm %s1982_s4, 128  ;;  %s1594_s15 = scalar_lea.hbm %s2037_s9, 256 }
 0x323   : > { %p1591_p9 = scmp.ne.s32.totalorder %s1982_s4, %s1590_s20  ;;  %p1595_p7 = scmp.lt.s32.totalorder %s1982_s4, %s2037_s9 }
 0x324   : > { %p1596_p13 = scmp.lt.s32.totalorder %s1594_s15, %s1590_s20 }
 0x325   : > { %p1592_p1 = pnand %p1591_p9, %p1831_p5 }
 0x326   : > { %p1597_p2 = por %p1596_p13, %p1595_p7 }
 0x327   : > { %p1593_p8 = pneg %p1592_p1 }
 0x329   : > { %p1598_p4 = pnand %p1597_p2, %p1593_p8 }
 0x32b   : > { %1601 = shalt.err (!%p1598_p4)
}
 0x32c   : > { %1297 = dma.vmem_to_hbm [thread:$0]  (%p1831_p5), %s1977_s0, 128, %s1982_s4, %s949_s6   ;;  %v938_v1 = vpop.f32.mrf.mxu1 }
 0x32e   : > { %v1278_v2 = vpop.f32.mrf.mxu1 }
 0x32f PF: > { %s2068_s30 = sld [smem:[#allocation22_spill]]  ;;  %p2071_p12 = scmp.ge.s32.totalorder %s1672_s14, 2 }
 0x330   : > { %s2069_s1 = sld [smem:[#allocation23_spill]] }
 0x335   : > { %s975_s2 = sand.u32 1, %s2068_s30  }
 0x336   : > { %p2070_p6 = scmp.ne.s32.totalorder %s2069_s1, 0  ;;  %s976_s16 = scalar_lea.sflag [#allocation6], %s975_s2 }
 0x338   : > { %p1320_p0 = pnand %p2071_p12, %p2070_p6 }
 0x33a   : > { %p1321_p3 = pneg %p1320_p0 }
 0x33c   : > { %1647 = dma.done.wait (%p1321_p3), %s976_s16, 128  }
 0x33d   : > { %1649 = vsyncadd (%p1321_p3), %s976_s16, 4294967168  ;;  %s32_s14 = sadd.s32 1, %s1672_s14   ;;  %s2072_s22 = sld [smem:[#allocation24_spill]] }
 0x33e   : > { %p29_p10 = scmp.ge.s32.totalorder %s32_s14, 4   ;;  %s2073_s30 = smov %s1656_s10 }
 0x33f   : > { %s2074_s10 = smov %s1660_s11  ;;  %s2075_s11 = smov %s1846_s27 }
 0x340   : > { %s2076_s12 = smov %s1668_s13  ;;  %31 = sbr.rel (!%p29_p10) target bundleno = 17 (0x11), region = 147 }
 0x343   : > { %s2077_s13 = smov %s2072_s22 }
 0x345   :  { %981 = vsyncpa [#allocation5], 1 }
 0x346   :  { %983 = vsyncpa [#allocation5 + $0x1], 1 }
 0x347   :  { %984 = vsyncpa [#allocation8], 1 }
 0x348   :  { %986 = vsyncpa [#allocation8 + $0x1], 1 }
 0x349   :  { %987 = vsyncpa [#allocation11], 1 }
 0x34a   :  { %988 = vsyncpa [#allocation14], 1 }
 0x34b   :  { %990 = vsyncpa [#allocation14 + $0x1], 1 }
 0x34c   :  { %991 = vsyncpa [#allocation6], 1 }
 0x34d   :  { %993 = vsyncpa [#allocation6 + $0x1], 1 }

</bundles_post_ra>
